<compile_context>
chip_gen: v6e
topology: v6e:2x2x1
jax: 0.10.0
libtpu: 0.0.40
codegen_flags: <defaults>
</compile_context>

<pallas_src>
import functools

import jax
import jax.numpy as jnp
from jax.experimental import pallas as pl
from jax.experimental.pallas import tpu as pltpu

_PTS_PER_ROW = 128          # points per interleaved row
_LANES = 3 * _PTS_PER_ROW   # 384 lanes per row (x,y,z interleaved)


def mlp_kernel(coef_ref, x_ref, o_ref):
    """Interleaved 3x3 affine map on (R, 384) tiles.

    coef_ref: VMEM (6, 384) period-3 lane patterns
              rows 0..4 -> weights for lane offsets delta = -2,-1,0,+1,+2
              row  5    -> bias pattern [b0 b1 b2 b0 b1 b2 ...]
    x_ref/o_ref: VMEM (R, 384); each row = 128 points [x y z x y z ...]

    out[l] = sum_k W[k, l%3] * x[3*(l//3) + k] + b[l%3]
           = sum_delta coef_delta[l] * roll(x, -delta)[l] + bias[l]
    (per-lane coefficients are zero wherever a roll would cross a point
     boundary, so the wraparound lanes never contribute).
    """
    x = x_ref[...].astype(jnp.float32)
    L = x_ref.shape[1]
    acc = x * coef_ref[2:3, :] + coef_ref[5:6, :]             # delta = 0, + bias
    acc = acc + pltpu.roll(x, 2, 1) * coef_ref[0:1, :]        # delta = -2
    acc = acc + pltpu.roll(x, 1, 1) * coef_ref[1:2, :]        # delta = -1
    acc = acc + pltpu.roll(x, L - 1, 1) * coef_ref[3:4, :]    # delta = +1
    acc = acc + pltpu.roll(x, L - 2, 1) * coef_ref[4:5, :]    # delta = +2
    o_ref[...] = acc.astype(o_ref.dtype)


@functools.partial(jax.jit, static_argnames=("tm",))
def mlp_forward(x, w1, b1, w2, b2, *, tm=262144):
    """x: (B, N, 3). Returns (B, N, 3), matching MLP.forward (bn1 unused)."""
    B, N, C = x.shape
    M = B * N
    out_dtype = x.dtype

    # ---- Fold fc1/fc2 (exact: no activation between them, bn1 never applied) --
    n_out = min(3, w2.shape[1])                               # fold [..., :3] too
    W = (w1 @ w2)[:, :n_out].astype(jnp.float32)              # (C_in, n_out)
    b = (b1 @ w2 + b2).reshape(-1)[:n_out].astype(jnp.float32)
    # TODO(synk): interleaved fast path is specialised to the module's 3-in/3-out
    # shape (the nn.Module defaults); other sizes would need a generic path.
    assert C == 3 and n_out == 3, "kernel specialised to input_size=output_size=3"

    # ---- Precompute period-3 weight/bias lane patterns (6, 384) ----------------
    c_lane = jnp.arange(_LANES) % 3                           # output channel per lane
    rows = []
    for delta in (-2, -1, 0, 1, 2):
        k = c_lane + delta                                    # input channel tapped
        valid = (k >= 0) & (k < 3)
        rows.append(jnp.where(valid, W[jnp.clip(k, 0, 2), c_lane], 0.0))
    rows.append(b[c_lane])
    coef = jnp.stack(rows).astype(jnp.float32)                # (6, 384)

    # ---- Free view of contiguous (M, 3) points as (rows, 384) ------------------
    n_rows = pl.cdiv(M, _PTS_PER_ROW)
    Mp = n_rows * _PTS_PER_ROW
    flat = x.reshape(-1)
    if Mp != M:                                  # pad only the <128-point tail
        flat = jnp.pad(flat, (0, 3 * (Mp - M)))
    x2d = flat.reshape(n_rows, _LANES)

    # ---- Tiling: big row tiles, ragged last block handled by Pallas masking ----
    tile_rows = max(8, tm // _PTS_PER_ROW)
    tile_rows = (tile_rows // 8) * 8             # sublane multiple
    if tile_rows >= n_rows:
        tile_rows = n_rows                       # single full-array block
    grid = (pl.cdiv(n_rows, tile_rows),)

    y2d = pl.pallas_call(
        mlp_kernel,
        out_shape=jax.ShapeDtypeStruct((n_rows, _LANES), out_dtype),
        grid=grid,
        in_specs=[
            pl.BlockSpec((6, _LANES), lambda i: (0, 0)),          # coef, resident
            pl.BlockSpec((tile_rows, _LANES), lambda i: (i, 0)),  # x tile
        ],
        out_specs=pl.BlockSpec((tile_rows, _LANES), lambda i: (i, 0)),
        compiler_params=pltpu.CompilerParams(
            dimension_semantics=("parallel",),   # shard rows across v7x's 2 TCs
            vmem_limit_bytes=32 * 1024 * 1024,   # safe on v5e/v6e/v7x defaults
        ),
    )(coef, x2d)

    y_flat = y2d.reshape(-1)
    if Mp != M:
        y_flat = y_flat[: 3 * M]
    return y_flat.reshape(B, N, n_out)


def init_params(key, input_size=3, output_size=3, hidden_size=10):
    """Deterministic init matching nn.Linear shapes (weights stored (in, out))."""
    k1, k2, k3, k4 = jax.random.split(key, 4)
    bound1 = 1.0 / jnp.sqrt(input_size)
    w1 = jax.random.uniform(k1, (input_size, hidden_size), jnp.float32, -bound1, bound1)
    b1 = jax.random.uniform(k2, (1, hidden_size), jnp.float32, -bound1, bound1)
    bound2 = 1.0 / jnp.sqrt(hidden_size)
    w2 = jax.random.uniform(k3, (hidden_size, output_size), jnp.float32, -bound2, bound2)
    b2 = jax.random.uniform(k4, (1, output_size), jnp.float32, -bound2, bound2)
    # TODO(synk): bn1 (BatchNorm1d) is declared in __init__ but never used in forward; omitted.
    return w1, b1, w2, b2


def _reference(x, w1, b1, w2, b2):
    B, N, C = x.shape
    y = (x.reshape(B * N, C) @ w1 + b1) @ w2 + b2
    return y.reshape(B, N, -1)[..., :3]


if __name__ == "__main__":
    key = jax.random.PRNGKey(0)
    kx, kp, kx2 = jax.random.split(key, 3)

    # Small shape consistent with the module's forward (B, N, C=3).
    B, N, C = 2, 8, 3
    x = jax.random.normal(kx, (B, N, C), jnp.float32)
    w1, b1, w2, b2 = init_params(kp, input_size=C, output_size=3, hidden_size=10)

    y = jax.block_until_ready(mlp_forward(x, w1, b1, w2, b2))
    ref = _reference(x, w1, b1, w2, b2)
    assert y.shape == (B, N, 3)
    assert jnp.allclose(y, ref, atol=1e-5, rtol=1e-5)

    # Second check: multi-block grid + ragged tail (exercises boundary masking).
    B2, N2 = 4, 2000                       # M = 8000 -> 63 rows, last block partial
    x2 = jax.random.normal(kx2, (B2, N2, C), jnp.float32)
    y2 = jax.block_until_ready(mlp_forward(x2, w1, b1, w2, b2, tm=1024))
    ref2 = _reference(x2, w1, b1, w2, b2)
    assert y2.shape == (B2, N2, 3)
    assert jnp.allclose(y2, ref2, atol=1e-5, rtol=1e-5)

    print("KERNEL_OK")
</pallas_src>

<mosaic_0001>
module attributes {stable_mosaic.version = 11 : i64} {
  func.func @mlp_kernel(%arg0: i32, %arg1: memref<6x384xf32, #tpu.memory_space<vmem>>, %arg2: memref<1x384xf32, #tpu.memory_space<vmem>>, %arg3: memref<1x384xf32, #tpu.memory_space<vmem>>) attributes {dimension_semantics = [#tpu.dimension_semantics<parallel>], iteration_bounds = array<i64: 1>, scalar_prefetch = 0 : i64, scratch_operands = 0 : i64, tpu.core_type = #tpu.core_type<tc>, window_params = [{pipeline_mode = #tpu.pipeline_mode<synchronous>, transform_indices = @transform_0, window_bounds = array<i64: 6, 384>}, {transform_indices = @transform_1, window_bounds = array<i64: 1, 384>}, {transform_indices = @transform_2, window_bounds = array<i64: 1, 384>}]} {
    %c0 = arith.constant 0 : index
    %c0_0 = arith.constant 0 : index
    %0 = vector.load %arg2[%c0, %c0_0] : memref<1x384xf32, #tpu.memory_space<vmem>>, vector<1x384xf32>
    %c2 = arith.constant 2 : index
    %c0_1 = arith.constant 0 : index
    %1 = vector.load %arg1[%c2, %c0_1] : memref<6x384xf32, #tpu.memory_space<vmem>>, vector<1x384xf32>
    %2 = arith.mulf %0, %1 : vector<1x384xf32>
    %c5 = arith.constant 5 : index
    %c0_2 = arith.constant 0 : index
    %3 = vector.load %arg1[%c5, %c0_2] : memref<6x384xf32, #tpu.memory_space<vmem>>, vector<1x384xf32>
    %4 = arith.addf %2, %3 : vector<1x384xf32>
    %c2_i32 = arith.constant 2 : i32
    %5 = tpu.dynamic_rotate %0 by %c2_i32 dim 1 : vector<1x384xf32>, i32 -> vector<1x384xf32>
    %c0_3 = arith.constant 0 : index
    %c0_4 = arith.constant 0 : index
    %6 = vector.load %arg1[%c0_3, %c0_4] : memref<6x384xf32, #tpu.memory_space<vmem>>, vector<1x384xf32>
    %7 = arith.mulf %5, %6 : vector<1x384xf32>
    %8 = arith.addf %4, %7 : vector<1x384xf32>
    %c1_i32 = arith.constant 1 : i32
    %9 = tpu.dynamic_rotate %0 by %c1_i32 dim 1 : vector<1x384xf32>, i32 -> vector<1x384xf32>
    %c1 = arith.constant 1 : index
    %c0_5 = arith.constant 0 : index
    %10 = vector.load %arg1[%c1, %c0_5] : memref<6x384xf32, #tpu.memory_space<vmem>>, vector<1x384xf32>
    %11 = arith.mulf %9, %10 : vector<1x384xf32>
    %12 = arith.addf %8, %11 : vector<1x384xf32>
    %c383_i32 = arith.constant 383 : i32
    %13 = tpu.dynamic_rotate %0 by %c383_i32 dim 1 : vector<1x384xf32>, i32 -> vector<1x384xf32>
    %c3 = arith.constant 3 : index
    %c0_6 = arith.constant 0 : index
    %14 = vector.load %arg1[%c3, %c0_6] : memref<6x384xf32, #tpu.memory_space<vmem>>, vector<1x384xf32>
    %15 = arith.mulf %13, %14 : vector<1x384xf32>
    %16 = arith.addf %12, %15 : vector<1x384xf32>
    %c382_i32 = arith.constant 382 : i32
    %17 = tpu.dynamic_rotate %0 by %c382_i32 dim 1 : vector<1x384xf32>, i32 -> vector<1x384xf32>
    %c4 = arith.constant 4 : index
    %c0_7 = arith.constant 0 : index
    %18 = vector.load %arg1[%c4, %c0_7] : memref<6x384xf32, #tpu.memory_space<vmem>>, vector<1x384xf32>
    %19 = arith.mulf %17, %18 : vector<1x384xf32>
    %20 = arith.addf %16, %19 : vector<1x384xf32>
    %c0_8 = arith.constant 0 : index
    %c0_9 = arith.constant 0 : index
    %21 = vector.load %arg3[%c0_8, %c0_9] : memref<1x384xf32, #tpu.memory_space<vmem>>, vector<1x384xf32>
    tpu.vector_store %arg3[%c0_8, %c0_9], %20 {strides = array<i32>} : memref<1x384xf32, #tpu.memory_space<vmem>>, vector<1x384xf32>,
    return
  }
  func.func @transform_0(%arg0: i32) -> (i32, i32) {
    %c0_i32 = arith.constant 0 : i32
    %c0_i32_0 = arith.constant 0 : i32
    %c0_i32_1 = arith.constant 0 : i32
    return %c0_i32, %c0_i32_0 : i32, i32
  }
  func.func @transform_1(%arg0: i32) -> (i32, i32) {
    %c0_i32 = arith.constant 0 : i32
    %c0_i32_0 = arith.constant 0 : i32
    return %arg0, %c0_i32 : i32, i32
  }
  func.func @transform_2(%arg0: i32) -> (i32, i32) {
    %c0_i32 = arith.constant 0 : i32
    %c0_i32_0 = arith.constant 0 : i32
    return %arg0, %c0_i32 : i32, i32
  }
}

</mosaic_0001>

<bundles_post_ra>
// kernel: mlp_forward.1
= control target key start
LH: loop header
LB: loop body
LE: loop exit
PB: predicated region body
PF: predicated region fallthrough
CT: control target
= control target key end

     0   :  { %v19_v0 = vlaneseq  ;;  %s290_s11 = smov 2   ;;  %s291_s12 = smov 1   ;;  %v294_v11 = vmov 1966171168   ;;  %s396_s1 = inlined_call_operand.vmem [shape: f32[1,384], index: 1, kind: input, shape index: {}]   ;;  %s397_s0 = inlined_call_operand.vmem [shape: f32[6,384], index: 0, kind: input, shape index: {}]   ;;  %s398_s2 = inlined_call_operand.vmem [shape: f32[1,384], index: 2, kind: output, shape index: {}]  }
   0x1   :  { %v11_v2 = vld [vmem:[%s396_s1] sm:$0x7]  ;;  %s292_s1 = smov 127   ;;  %s293_s13 = smov 126   ;;  %v71_v12 = vunpack.c.l.s4 %v294_v11 }
   0x2   :  { %v20_v1 = vshrl.u32 %v19_v0, 7  ;;  %v324_v9 = vand.u32 127, %v19_v0  ;;  %v46_v10 = vld [vmem:[%s397_s0] ss:$8 sm:$0x7]  ;;  %vm273_vm4 = vcmp.lt.s32.totalorder %v19_v0, 384 }
   0x3   :  { %v72_v14 = vunpack.c.0.s8 %v71_v12  ;;  %v282_v21 = vld [vmem:[%s397_s0 + $0x1] ss:$8 sm:$0x7]  ;;  %v280_v25 = vld [vmem:[%s397_s0 + $0x2] ss:$8 sm:$0x7] }
   0x4   :  { %v314_v3 = vsub.s32 2, %v20_v1  ;;  %v316_v4 = vsub.s32 0, %v20_v1  ;;  %v318_v5 = vsub.s32 1, %v20_v1  ;;  %vm42_vm0 = vcmp.lt.s32.totalorder %v324_v9, 2 }
   0x5   :  { %v336_v22 = vsub.s32 %v72_v14, %v20_v1  ;;  %vm100_vm1 = vcmp.lt.s32.totalorder %v324_v9, 1  ;;  %v283_v33 = vld [vmem:[%s397_s0 + $0x3] ss:$8 sm:$0x7]  ;;  %v14_v34 = vmul.f32 %v280_v25, %v11_v2  ;;  %vm159_vm2 = vcmp.lt.s32.totalorder %v324_v9, 127 }
   0x6   :  { %v30_v6 = vrot.slane %v11_v2, %v314_v3  ;;  %v22_v7 = vrot.slane %v11_v2, %v316_v4  ;;  %v26_v8 = vrot.slane %v11_v2, %v318_v5  ;;  %v51_v13 = vrot.slane %v46_v10, %v316_v4  ;;  %v281_v39 = vld [vmem:[%s397_s0 + $0x5] ss:$8 sm:$0x7]  ;;  %v284_v60 = vld [vmem:[%s397_s0 + $0x4] ss:$8 sm:$0x7] }
   0x7   :  { %v55_v19 = vrot.slane %v46_v10, %v318_v5  ;;  %v59_v20 = vrot.slane %v46_v10, %v314_v3  ;;  %v110_v28 = vrot.slane %v282_v21, %v316_v4  ;;  %v114_v31 = vrot.slane %v282_v21, %v318_v5 }
   0x8   :  { %38 = vrot.lane.b32.xlu1 %v30_v6, %s290_s11  ;;  %34 = vrot.lane.b32.xlu0 %v22_v7, %s290_s11  ;;  %v118_v32 = vrot.slane %v282_v21, %v314_v3  ;;  %v169_v43 = vrot.slane %v283_v33, %v316_v4  ;;  %v17_v48 = vadd.f32 %v281_v39, %v14_v34  ;;  %vm218_vm3 = vcmp.lt.s32.totalorder %v324_v9, 126 }
   0x9   :  { %v173_v55 = vrot.slane %v283_v33, %v318_v5  ;;  %v177_v59 = vrot.slane %v283_v33, %v314_v3 }
   0xc   :  { %94 = vrot.lane.b32.xlu1 %v22_v7, %s291_s12  ;;  %36 = vrot.lane.b32.xlu0 %v26_v8, %s290_s11 }
  0x10   :  { %98 = vrot.lane.b32.xlu1 %v30_v6, %s291_s12  ;;  %96 = vrot.lane.b32.xlu0 %v26_v8, %s291_s12 }
  0x14   :  { %155 = vrot.lane.b32.xlu1 %v26_v8, %s292_s1  ;;  %153 = vrot.lane.b32.xlu0 %v22_v7, %s292_s1 }
  0x18   :  { %212 = vrot.lane.b32.xlu1 %v22_v7, %s293_s13  ;;  %157 = vrot.lane.b32.xlu0 %v30_v6, %s292_s1  ;;  %v236_v7 = vrot.slane %v284_v60, %v314_v3 }
  0x1c   :  { %216 = vrot.lane.b32.xlu1 %v30_v6, %s293_s13  ;;  %214 = vrot.lane.b32.xlu0 %v26_v8, %s293_s13  ;;  %v228_v8 = vrot.slane %v284_v60, %v316_v4 }
  0x7a   :  { %v39_v15 = vpop.permute.xlu1 %38  ;;  %v35_v16 = vpop.permute.xlu0 %34 }
  0x7b   :  { %v45_v17 = vsel %vm42_vm0, %v39_v15, %v35_v16 }
  0x7c   :  { %v63_v18 = vmul.f32 %v51_v13, %v45_v17  ;;  %v232_v13 = vrot.slane %v284_v60, %v318_v5 }
  0x7e   :  { %v95_v23 = vpop.permute.xlu1 %94  ;;  %v37_v24 = vpop.permute.xlu0 %36 }
  0x7f   :  { %v43_v26 = vsel %vm42_vm0, %v37_v24, %v39_v15  ;;  %v44_v27 = vsel %vm42_vm0, %v35_v16, %v37_v24 }
  0x80   :  { %v64_v29 = vmul.f32 %v55_v19, %v44_v27  ;;  %v65_v30 = vmul.f32 %v59_v20, %v43_v26 }
  0x82   :  { %v69_v35 = vcombine.low %v63_v18, %v64_v29  ;;  %v83_v36 = vrot.slane %v65_v30, %v336_v22  ;;  %v99_v37 = vpop.permute.xlu1 %98  ;;  %v97_v38 = vpop.permute.xlu0 %96 }
  0x83   :  { %v103_v40 = vsel %vm100_vm1, %v99_v37, %v95_v23  ;;  %v101_v41 = vsel %vm100_vm1, %v97_v38, %v99_v37  ;;  %v102_v42 = vsel %vm100_vm1, %v95_v23, %v97_v38 }
  0x84   :  { %v76_v44 = vrot.slane %v69_v35, %v336_v22  ;;  %v122_v45 = vmul.f32 %v110_v28, %v103_v40  ;;  %v123_v46 = vmul.f32 %v114_v31, %v102_v42  ;;  %v124_v47 = vmul.f32 %v118_v32, %v101_v41 }
  0x86   :  { %v84_v49 = vcombine.low %v76_v44, %v83_v36  ;;  %v128_v50 = vcombine.low %v122_v45, %v123_v46  ;;  %v142_v51 = vrot.slane %v124_v47, %v336_v22  ;;  %v156_v52 = vpop.permute.xlu1 %155  ;;  %v154_v53 = vpop.permute.xlu0 %153 }
  0x87   :  { %v161_v54 = vsel %vm159_vm2, %v154_v53, %v156_v52 }
  0x88   :  { %v91_v56 = vrot.slane %v84_v49, %v336_v22  ;;  %v135_v57 = vrot.slane %v128_v50, %v336_v22  ;;  %v181_v58 = vmul.f32 %v169_v43, %v161_v54 }
  0x8a   :  { %v93_v61 = vadd.f32 %v91_v56, %v17_v48  ;;  %v143_v62 = vcombine.low %v135_v57, %v142_v51  ;;  %v213_v63 = vpop.permute.xlu1 %212  ;;  %v158_v1 = vpop.permute.xlu0 %157 }
  0x8b   :  { %v160_v2 = vsel %vm159_vm2, %v156_v52, %v158_v1  ;;  %v162_v6 = vsel %vm159_vm2, %v158_v1, %v154_v53 }
  0x8c   :  { %v150_v10 = vrot.slane %v143_v62, %v336_v22  ;;  %v182_v11 = vmul.f32 %v173_v55, %v160_v2  ;;  %v183_v12 = vmul.f32 %v177_v59, %v162_v6 }
  0x8e   :  { %v152_v14 = vadd.f32 %v150_v10, %v93_v61  ;;  %v187_v15 = vcombine.low %v181_v58, %v182_v11  ;;  %v201_v16 = vrot.slane %v183_v12, %v336_v22  ;;  %v217_v17 = vpop.permute.xlu1 %216  ;;  %v215_v18 = vpop.permute.xlu0 %214 }
  0x8f   :  { %v221_v19 = vsel %vm218_vm3, %v217_v17, %v213_v63  ;;  %v219_v3 = vsel %vm218_vm3, %v215_v18, %v217_v17  ;;  %v220_v4 = vsel %vm218_vm3, %v213_v63, %v215_v18 }
  0x90   :  { %v194_v20 = vrot.slane %v187_v15, %v336_v22  ;;  %v242_v21 = vmul.f32 %v236_v7, %v221_v19  ;;  %v240_v23 = vmul.f32 %v228_v8, %v220_v4  ;;  %v241_v5 = vmul.f32 %v232_v13, %v219_v3 }
  0x92   :  { %v202_v24 = vcombine.low %v194_v20, %v201_v16  ;;  %v260_v25 = vrot.slane %v242_v21, %v336_v22  ;;  %v246_v26 = vcombine.low %v240_v23, %v241_v5 }
  0x94   :  { %v209_v27 = vrot.slane %v202_v24, %v336_v22  ;;  %v253_v28 = vrot.slane %v246_v26, %v336_v22 }
  0x96   :  { %v211_v29 = vadd.f32 %v209_v27, %v152_v14  ;;  %v261_v30 = vcombine.low %v253_v28, %v260_v25 }
  0x98   :  { %v268_v31 = vrot.slane %v261_v30, %v336_v22 }
  0x9a   :  { %v270_v9 = vadd.f32 %v268_v31, %v211_v29 }
  0x9c   :  { %275 = vst.msk [vmem:[%s398_s2] sm:$0x7] %vm273_vm4, %v270_v9 }

</bundles_post_ra>
